<compile_context>
chip_gen: v5e
topology: v5e:2x2
jax: 0.10.0
libtpu: 0.0.40
codegen_flags: <defaults>
</compile_context>

<pallas_src>
import functools
import math

import jax
import jax.numpy as jnp
from jax.experimental import pallas as pl
from jax.experimental.pallas import tpu as pltpu


def _pma_kernel(q_ref, x_ref, m_ref, wkv_ref, bkv_ref, wo_ref, bo_ref,
                e_ref, et_ref, o_ref, *, num_heads, num_seeds, scale):
    """One grid step == TB batch elements.

    q_ref   : (num_seeds, D)   fc_q(S) + bq, hoisted (batch invariant)
    x_ref   : (TB, N, D)       set elements
    m_ref   : (TB, N, 1)       multiplicative key mask
    wkv_ref : (D, 2D)          [Wk^T | Wv^T]  (fused, pre-transposed)
    bkv_ref : (1, 2D)          [bk   | bv  ]
    wo_ref  : (D, D)           Wo^T
    bo_ref  : (1, D)
    e_ref   : (D, H)           E[d, h] = 1 iff feature d belongs to head h
    et_ref  : (H, D)           E^T
    o_ref   : (TB, num_seeds, D)
    """
    TB, N, D = x_ref.shape

    # --- fused K/V projection: one (TB*N, D) @ (D, 2D) MXU pass ---------------
    x2 = x_ref[...].reshape(TB * N, D)
    kv = jnp.dot(x2, wkv_ref[...], preferred_element_type=jnp.float32) + bkv_ref[...]
    # TODO(synk): cast x2/wkv to bfloat16 (f32 accumulation) for ~2x MXU
    # throughput and halved DMA on v5e/v6e/v7x; kept f32 for the strict parity check.
    k = kv[:, :D].reshape(TB, N, D) * m_ref[...]   # K = K * M (multiplicative, as in ref)
    v = kv[:, D:].reshape(TB, N, D)

    q = q_ref[...]              # (num_seeds, D)
    e = e_ref[...]              # (D, H)
    et = et_ref[...]            # (H, D)

    for s in range(num_seeds):  # static loop; num_seeds == 1 for the PMA default
        qs = q[s:s + 1, :]                                          # (1, D)

        # Per-head scores via the block-diagonal head indicator:
        #   sc[b*n, h] = sum_{d in head h} q[s, d] * k[b, n, d]
        qk = (k * qs).reshape(TB * N, D)                            # (TB*N, D)
        sc = jnp.dot(qk, e, preferred_element_type=jnp.float32) * scale
        sc = sc.reshape(TB, N, num_heads)                           # (TB, N, H)

        # Softmax over the set dimension N (per batch element, per head).
        sc = sc - jnp.max(sc, axis=1, keepdims=True)
        p = jnp.exp(sc)
        a = p / jnp.sum(p, axis=1, keepdims=True)                   # (TB, N, H)

        # Expand head weights back to features and contract over N:
        #   attn[b, d] = sum_n a[b, n, head(d)] * v[b, n, d]
        a_exp = jnp.dot(a.reshape(TB * N, num_heads), et,
                        preferred_element_type=jnp.float32).reshape(TB, N, D)
        attn = jnp.sum(a_exp * v, axis=1)                           # (TB, D)

        o = qs + attn                                               # residual with projected Q
        o = o + jax.nn.relu(
            jnp.dot(o, wo_ref[...], preferred_element_type=jnp.float32) + bo_ref[...])
        o_ref[:, s, :] = o


def _choose_tb(B, N, D, *, bytes_per_elem=4, x_block_budget=1 << 20):
    """Largest TB dividing B whose (TB, N, D) X block fits the VMEM budget.

    Bigger TB fills the MXU M dimension (ideally TB*N a multiple of 256 on
    v6e/v7x, 128 on v5e) and amortizes the ~0.35us/step grid overhead.
    """
    tb = 1
    for cand in range(1, B + 1):
        if B % cand == 0 and cand * N * D * bytes_per_elem <= x_block_budget:
            tb = cand
    return tb


def pma_forward(S, X, M, params, *, num_heads, single_buffer_weights=True):
    """S: (1, num_seeds, D), X: (B, N, D), M: (B, N, 1) -> (B, num_seeds, D)."""
    B, N, D = X.shape
    num_seeds = S.shape[1]
    assert D % num_heads == 0, "dim must be divisible by num_heads"
    Wq, bq, Wk, bk, Wv, bv, Wo, bo = params

    # Batch-invariant Q projection, hoisted out of the kernel (tiny matmul).
    q = jnp.dot(S[0], Wq.T, precision=jax.lax.Precision.HIGHEST) + bq   # (num_seeds, D)

    # Pre-transposed, fused K/V projection weights; pre-transposed Wo.
    Wkv_t = jnp.concatenate([Wk.T, Wv.T], axis=1)             # (D, 2D)
    bkv = jnp.concatenate([bk, bv]).reshape(1, 2 * D)         # (1, 2D)
    Wo_t = Wo.T                                               # (D, D)
    bo2 = bo.reshape(1, D)

    # Block-diagonal head indicator: E[d, h] = 1 iff feature d belongs to head h.
    ds = D // num_heads
    E = (jnp.arange(D)[:, None] // ds
         == jnp.arange(num_heads)[None, :]).astype(jnp.float32)   # (D, H)
    Et = E.T                                                      # (H, D)

    # TODO(synk): for very long sets N, add an inner "arbitrary" grid axis over
    # N-chunks with online-softmax accumulation instead of holding (N, D) K/V.
    TB = _choose_tb(B, N, D)
    grid = (B // TB,)

    scale = 1.0 / math.sqrt(D)   # reference scales by sqrt(dim_V), not sqrt(head_dim)
    kernel = functools.partial(_pma_kernel, num_heads=num_heads,
                               num_seeds=num_seeds, scale=scale)

    # Grid-invariant operands: constant index_map; optionally single-buffered so
    # only one VMEM copy is kept (they are fetched once and never change).
    inv_kwargs = {"pipeline_mode": pl.Buffered(1)} if single_buffer_weights else {}

    def const_spec(shape):
        return pl.BlockSpec(shape, lambda b: (0,) * len(shape), **inv_kwargs)

    flops = (4 * B * N * D * D                                    # fused K/V projection
             + num_seeds * B * N * D * (2 * num_heads + 6)        # head-indicator attention
             + 4 * B * num_seeds * D * D)                         # fc_o + residual
    transcendentals = B * num_seeds * N * num_heads               # softmax exp
    bytes_accessed = 4 * (B * N * D + B * N + B * num_seeds * D
                          + 3 * D * D + 2 * D * num_heads + 4 * D)

    return pl.pallas_call(
        kernel,
        out_shape=jax.ShapeDtypeStruct((B, num_seeds, D), jnp.float32),
        grid=grid,
        in_specs=[
            const_spec((num_seeds, D)),                        # q = fc_q(S)  (hoisted)
            pl.BlockSpec((TB, N, D), lambda b: (b, 0, 0)),     # X
            pl.BlockSpec((TB, N, 1), lambda b: (b, 0, 0)),     # M
            const_spec((D, 2 * D)),                            # [Wk^T | Wv^T]
            const_spec((1, 2 * D)),                            # [bk | bv]
            const_spec((D, D)),                                # Wo^T
            const_spec((1, D)),                                # bo
            const_spec((D, num_heads)),                        # E
            const_spec((num_heads, D)),                        # E^T
        ],
        out_specs=pl.BlockSpec((TB, num_seeds, D), lambda b: (b, 0, 0)),
        compiler_params=pltpu.CompilerParams(
            dimension_semantics=("parallel",),                 # batch-block axis -> megacore
            vmem_limit_bytes=32 * 1024 * 1024),
        cost_estimate=pl.CostEstimate(flops=flops,
                                      transcendentals=transcendentals,
                                      bytes_accessed=bytes_accessed),
    )(q, X, M, Wkv_t, bkv, Wo_t, bo2, E, Et)


def pma_reference(S, X, M, params, *, num_heads):
    """Pure-JAX mirror of the PyTorch forward, for verification."""
    B, N, D = X.shape
    Wq, bq, Wk, bk, Wv, bv, Wo, bo = params
    Q = jnp.tile(S, (B, 1, 1))
    Q = Q @ Wq.T + bq
    K = X @ Wk.T + bk
    V = X @ Wv.T + bv
    K = K * M
    Q_ = jnp.concatenate(jnp.split(Q, num_heads, axis=2), axis=0)
    K_ = jnp.concatenate(jnp.split(K, num_heads, axis=2), axis=0)
    V_ = jnp.concatenate(jnp.split(V, num_heads, axis=2), axis=0)
    A = jax.nn.softmax(
        jnp.einsum('bsd,bnd->bsn', Q_, K_) / math.sqrt(D), axis=2)
    O = Q_ + jnp.einsum('bsn,bnd->bsd', A, V_)
    O = jnp.concatenate(jnp.split(O, num_heads, axis=0), axis=2)
    O = O + jax.nn.relu(O @ Wo.T + bo)
    return O


if __name__ == "__main__":
    B, N, D, H, NUM_SEEDS = 2, 8, 32, 4, 1

    key = jax.random.PRNGKey(0)
    ks = jax.random.split(key, 12)

    # Deterministic synthetic parameters (xavier-ish scaling).
    scale_lin = 1.0 / math.sqrt(D)
    S = jax.random.uniform(ks[0], (1, NUM_SEEDS, D), jnp.float32, -scale_lin, scale_lin)
    Wq = jax.random.uniform(ks[1], (D, D), jnp.float32, -scale_lin, scale_lin)
    bq = jax.random.uniform(ks[2], (D,), jnp.float32, -scale_lin, scale_lin)
    Wk = jax.random.uniform(ks[3], (D, D), jnp.float32, -scale_lin, scale_lin)
    bk = jax.random.uniform(ks[4], (D,), jnp.float32, -scale_lin, scale_lin)
    Wv = jax.random.uniform(ks[5], (D, D), jnp.float32, -scale_lin, scale_lin)
    bv = jax.random.uniform(ks[6], (D,), jnp.float32, -scale_lin, scale_lin)
    Wo = jax.random.uniform(ks[7], (D, D), jnp.float32, -scale_lin, scale_lin)
    bo = jax.random.uniform(ks[8], (D,), jnp.float32, -scale_lin, scale_lin)
    params = (Wq, bq, Wk, bk, Wv, bv, Wo, bo)

    # Inputs: a set of N elements per batch and a binary key mask.
    X = jax.random.normal(ks[9], (B, N, D), jnp.float32)
    M = (jax.random.uniform(ks[10], (B, N, 1)) > 0.3).astype(jnp.float32)

    try:
        out = pma_forward(S, X, M, params, num_heads=H)
    except Exception:
        # pl.Buffered(1) single-buffering of the grid-invariant weights is a
        # VMEM-only optimization; fall back to default double buffering if this
        # Pallas build rejects it.
        out = pma_forward(S, X, M, params, num_heads=H, single_buffer_weights=False)
    out = jax.block_until_ready(out)

    with jax.default_matmul_precision("highest"):
        ref = pma_reference(S, X, M, params, num_heads=H)

    assert out.shape == (B, NUM_SEEDS, D)
    err = float(jnp.max(jnp.abs(out - ref)))
    # Tolerance accommodates TPU DEFAULT-precision (bf16-pass) f32 MXU matmuls
    # on either the kernel or the reference path.
    assert err < 2e-2, f"max abs err {err}"
    print("KERNEL_OK")
</pallas_src>

<mosaic_0001>
module attributes {stable_mosaic.version = 11 : i64} {
  func.func @_pma_kernel(%arg0: i32, %arg1: memref<1x32xf32, #tpu.memory_space<vmem>>, %arg2: memref<2x8x32xf32, #tpu.memory_space<vmem>>, %arg3: memref<2x8x1xf32, #tpu.memory_space<vmem>>, %arg4: memref<32x64xf32, #tpu.memory_space<vmem>>, %arg5: memref<1x64xf32, #tpu.memory_space<vmem>>, %arg6: memref<32x32xf32, #tpu.memory_space<vmem>>, %arg7: memref<1x32xf32, #tpu.memory_space<vmem>>, %arg8: memref<32x4xf32, #tpu.memory_space<vmem>>, %arg9: memref<4x32xf32, #tpu.memory_space<vmem>>, %arg10: memref<2x1x32xf32, #tpu.memory_space<vmem>>) attributes {dimension_semantics = [#tpu.dimension_semantics<parallel>], iteration_bounds = array<i64: 1>, scalar_prefetch = 0 : i64, scratch_operands = 0 : i64, tpu.core_type = #tpu.core_type<tc>, window_params = [{pipeline_mode = #tpu.pipeline_mode<synchronous>, transform_indices = @transform_0, window_bounds = array<i64: 1, 32>}, {transform_indices = @transform_1, window_bounds = array<i64: 2, 8, 32>}, {transform_indices = @transform_2, window_bounds = array<i64: 2, 8, 1>}, {pipeline_mode = #tpu.pipeline_mode<synchronous>, transform_indices = @transform_3, window_bounds = array<i64: 32, 64>}, {pipeline_mode = #tpu.pipeline_mode<synchronous>, transform_indices = @transform_4, window_bounds = array<i64: 1, 64>}, {pipeline_mode = #tpu.pipeline_mode<synchronous>, transform_indices = @transform_5, window_bounds = array<i64: 32, 32>}, {pipeline_mode = #tpu.pipeline_mode<synchronous>, transform_indices = @transform_6, window_bounds = array<i64: 1, 32>}, {pipeline_mode = #tpu.pipeline_mode<synchronous>, transform_indices = @transform_7, window_bounds = array<i64: 32, 4>}, {pipeline_mode = #tpu.pipeline_mode<synchronous>, transform_indices = @transform_8, window_bounds = array<i64: 4, 32>}, {transform_indices = @transform_9, window_bounds = array<i64: 2, 1, 32>}]} {
    %c0 = arith.constant 0 : index
    %c0_0 = arith.constant 0 : index
    %c0_1 = arith.constant 0 : index
    %0 = vector.load %arg2[%c0, %c0_0, %c0_1] : memref<2x8x32xf32, #tpu.memory_space<vmem>>, vector<2x8x32xf32>
    %1 = vector.shape_cast %0 : vector<2x8x32xf32> to vector<16x32xf32>
    %c0_2 = arith.constant 0 : index
    %c0_3 = arith.constant 0 : index
    %2 = vector.load %arg4[%c0_2, %c0_3] : memref<32x64xf32, #tpu.memory_space<vmem>>, vector<32x64xf32>
    %cst = arith.constant dense<0.000000e+00> : vector<16x64xf32>
    %3 = tpu.matmul %1, %2, %cst {dimension_numbers = #tpu.dot_dimension_numbers<[1], [0], [0], [1], [0, 0, 1, 1], [], []>} : vector<16x32xf32>, vector<32x64xf32>, vector<16x64xf32> -> vector<16x64xf32>
    %c0_4 = arith.constant 0 : index
    %c0_5 = arith.constant 0 : index
    %4 = vector.load %arg5[%c0_4, %c0_5] : memref<1x64xf32, #tpu.memory_space<vmem>>, vector<1x64xf32>
    %5 = vector.broadcast %4 : vector<1x64xf32> to vector<16x64xf32>
    %6 = arith.addf %3, %5 : vector<16x64xf32>
    %7 = vector.extract_strided_slice %6 {offsets = [0, 0], sizes = [16, 32], strides = [1, 1]} : vector<16x64xf32> to vector<16x32xf32>
    %8 = vector.shape_cast %7 : vector<16x32xf32> to vector<2x8x32xf32>
    %c0_6 = arith.constant 0 : index
    %c0_7 = arith.constant 0 : index
    %c0_8 = arith.constant 0 : index
    %9 = vector.load %arg3[%c0_6, %c0_7, %c0_8] : memref<2x8x1xf32, #tpu.memory_space<vmem>>, vector<2x8x1xf32>
    %10 = vector.broadcast %9 : vector<2x8x1xf32> to vector<2x8x32xf32>
    %11 = arith.mulf %8, %10 : vector<2x8x32xf32>
    %12 = vector.extract_strided_slice %6 {offsets = [0, 32], sizes = [16, 32], strides = [1, 1]} : vector<16x64xf32> to vector<16x32xf32>
    %13 = vector.shape_cast %12 : vector<16x32xf32> to vector<2x8x32xf32>
    %c0_9 = arith.constant 0 : index
    %c0_10 = arith.constant 0 : index
    %14 = vector.load %arg1[%c0_9, %c0_10] : memref<1x32xf32, #tpu.memory_space<vmem>>, vector<1x32xf32>
    %c0_11 = arith.constant 0 : index
    %c0_12 = arith.constant 0 : index
    %15 = vector.load %arg8[%c0_11, %c0_12] : memref<32x4xf32, #tpu.memory_space<vmem>>, vector<32x4xf32>
    %c0_13 = arith.constant 0 : index
    %c0_14 = arith.constant 0 : index
    %16 = vector.load %arg9[%c0_13, %c0_14] : memref<4x32xf32, #tpu.memory_space<vmem>>, vector<4x32xf32>
    %17 = vector.shape_cast %14 : vector<1x32xf32> to vector<1x1x32xf32>
    %18 = vector.broadcast %17 : vector<1x1x32xf32> to vector<2x8x32xf32>
    %19 = arith.mulf %11, %18 : vector<2x8x32xf32>
    %20 = vector.shape_cast %19 : vector<2x8x32xf32> to vector<16x32xf32>
    %cst_15 = arith.constant dense<0.000000e+00> : vector<16x4xf32>
    %21 = tpu.matmul %20, %15, %cst_15 {dimension_numbers = #tpu.dot_dimension_numbers<[1], [0], [0], [1], [0, 0, 1, 1], [], []>} : vector<16x32xf32>, vector<32x4xf32>, vector<16x4xf32> -> vector<16x4xf32>
    %cst_16 = arith.constant 0.176776692 : f32
    %22 = vector.broadcast %cst_16 : f32 to vector<16x4xf32>
    %23 = arith.mulf %21, %22 : vector<16x4xf32>
    %24 = vector.shape_cast %23 : vector<16x4xf32> to vector<2x8x4xf32>
    %cst_17 = arith.constant dense<0xFF800000> : vector<2x4xf32>
    %25 = vector.multi_reduction <maximumf>, %24, %cst_17 [1] : vector<2x8x4xf32> to vector<2x4xf32>
    %26 = vector.shape_cast %25 : vector<2x4xf32> to vector<2x1x4xf32>
    %27 = vector.broadcast %26 : vector<2x1x4xf32> to vector<2x8x4xf32>
    %28 = arith.subf %24, %27 : vector<2x8x4xf32>
    %29 = math.exp %28 : vector<2x8x4xf32>
    %cst_18 = arith.constant dense<0.000000e+00> : vector<2x4xf32>
    %30 = vector.multi_reduction <add>, %29, %cst_18 [1] : vector<2x8x4xf32> to vector<2x4xf32>
    %31 = vector.shape_cast %30 : vector<2x4xf32> to vector<2x1x4xf32>
    %32 = vector.broadcast %31 : vector<2x1x4xf32> to vector<2x8x4xf32>
    %33 = arith.divf %29, %32 : vector<2x8x4xf32>
    %34 = vector.shape_cast %33 : vector<2x8x4xf32> to vector<16x4xf32>
    %cst_19 = arith.constant dense<0.000000e+00> : vector<16x32xf32>
    %35 = tpu.matmul %34, %16, %cst_19 {dimension_numbers = #tpu.dot_dimension_numbers<[1], [0], [0], [1], [0, 0, 1, 1], [], []>} : vector<16x4xf32>, vector<4x32xf32>, vector<16x32xf32> -> vector<16x32xf32>
    %36 = vector.shape_cast %35 : vector<16x32xf32> to vector<2x8x32xf32>
    %37 = arith.mulf %36, %13 : vector<2x8x32xf32>
    %cst_20 = arith.constant dense<0.000000e+00> : vector<2x32xf32>
    %38 = vector.multi_reduction <add>, %37, %cst_20 [1] : vector<2x8x32xf32> to vector<2x32xf32>
    %39 = vector.broadcast %14 : vector<1x32xf32> to vector<2x32xf32>
    %40 = arith.addf %39, %38 : vector<2x32xf32>
    %c0_21 = arith.constant 0 : index
    %c0_22 = arith.constant 0 : index
    %41 = vector.load %arg6[%c0_21, %c0_22] : memref<32x32xf32, #tpu.memory_space<vmem>>, vector<32x32xf32>
    %cst_23 = arith.constant dense<0.000000e+00> : vector<2x32xf32>
    %42 = tpu.matmul %40, %41, %cst_23 {dimension_numbers = #tpu.dot_dimension_numbers<[1], [0], [0], [1], [0, 0, 1, 1], [], []>} : vector<2x32xf32>, vector<32x32xf32>, vector<2x32xf32> -> vector<2x32xf32>
    %c0_24 = arith.constant 0 : index
    %c0_25 = arith.constant 0 : index
    %43 = vector.load %arg7[%c0_24, %c0_25] : memref<1x32xf32, #tpu.memory_space<vmem>>, vector<1x32xf32>
    %44 = vector.broadcast %43 : vector<1x32xf32> to vector<2x32xf32>
    %45 = arith.addf %42, %44 : vector<2x32xf32>
    %cst_26 = arith.constant 0.000000e+00 : f32
    %46 = vector.broadcast %cst_26 : f32 to vector<2x32xf32>
    %47 = arith.maximumf %45, %46 : vector<2x32xf32>
    %48 = arith.addf %40, %47 : vector<2x32xf32>
    %c0_27 = arith.constant 0 : index
    %c0_28 = arith.constant 0 : index
    %c0_29 = arith.constant 0 : index
    %49 = vector.load %arg10[%c0_27, %c0_28, %c0_29] : memref<2x1x32xf32, #tpu.memory_space<vmem>>, vector<2x1x32xf32>
    %50 = vector.shape_cast %49 : vector<2x1x32xf32> to vector<2x32xf32>
    %51 = vector.shape_cast %48 : vector<2x32xf32> to vector<2x1x32xf32>
    tpu.vector_store %arg10[%c0_27, %c0_28, %c0_29], %51 {strides = array<i32>} : memref<2x1x32xf32, #tpu.memory_space<vmem>>, vector<2x1x32xf32>,
    return
  }
  func.func @transform_0(%arg0: i32) -> (i32, i32) {
    %c0_i32 = arith.constant 0 : i32
    %c0_i32_0 = arith.constant 0 : i32
    %c0_i32_1 = arith.constant 0 : i32
    return %c0_i32, %c0_i32_0 : i32, i32
  }
  func.func @transform_1(%arg0: i32) -> (i32, i32, i32) {
    %c0_i32 = arith.constant 0 : i32
    %c0_i32_0 = arith.constant 0 : i32
    %c0_i32_1 = arith.constant 0 : i32
    return %arg0, %c0_i32, %c0_i32_0 : i32, i32, i32
  }
  func.func @transform_2(%arg0: i32) -> (i32, i32, i32) {
    %c0_i32 = arith.constant 0 : i32
    %c0_i32_0 = arith.constant 0 : i32
    %c0_i32_1 = arith.constant 0 : i32
    return %arg0, %c0_i32, %c0_i32_0 : i32, i32, i32
  }
  func.func @transform_3(%arg0: i32) -> (i32, i32) {
    %c0_i32 = arith.constant 0 : i32
    %c0_i32_0 = arith.constant 0 : i32
    %c0_i32_1 = arith.constant 0 : i32
    return %c0_i32, %c0_i32_0 : i32, i32
  }
  func.func @transform_4(%arg0: i32) -> (i32, i32) {
    %c0_i32 = arith.constant 0 : i32
    %c0_i32_0 = arith.constant 0 : i32
    %c0_i32_1 = arith.constant 0 : i32
    return %c0_i32, %c0_i32_0 : i32, i32
  }
  func.func @transform_5(%arg0: i32) -> (i32, i32) {
    %c0_i32 = arith.constant 0 : i32
    %c0_i32_0 = arith.constant 0 : i32
    %c0_i32_1 = arith.constant 0 : i32
    return %c0_i32, %c0_i32_0 : i32, i32
  }
  func.func @transform_6(%arg0: i32) -> (i32, i32) {
    %c0_i32 = arith.constant 0 : i32
    %c0_i32_0 = arith.constant 0 : i32
    %c0_i32_1 = arith.constant 0 : i32
    return %c0_i32, %c0_i32_0 : i32, i32
  }
  func.func @transform_7(%arg0: i32) -> (i32, i32) {
    %c0_i32 = arith.constant 0 : i32
    %c0_i32_0 = arith.constant 0 : i32
    %c0_i32_1 = arith.constant 0 : i32
    return %c0_i32, %c0_i32_0 : i32, i32
  }
  func.func @transform_8(%arg0: i32) -> (i32, i32) {
    %c0_i32 = arith.constant 0 : i32
    %c0_i32_0 = arith.constant 0 : i32
    %c0_i32_1 = arith.constant 0 : i32
    return %c0_i32, %c0_i32_0 : i32, i32
  }
  func.func @transform_9(%arg0: i32) -> (i32, i32, i32) {
    %c0_i32 = arith.constant 0 : i32
    %c0_i32_0 = arith.constant 0 : i32
    %c0_i32_1 = arith.constant 0 : i32
    return %arg0, %c0_i32, %c0_i32_0 : i32, i32, i32
  }
}

module attributes {stable_mosaic.version = 11 : i64} {
  func.func @_pma_kernel(%arg0: i32, %arg1: memref<1x32xf32, #tpu.memory_space<vmem>>, %arg2: memref<2x8x32xf32, #tpu.memory_space<vmem>>, %arg3: memref<2x8x1xf32, #tpu.memory_space<vmem>>, %arg4: memref<32x64xf32, #tpu.memory_space<vmem>>, %arg5: memref<1x64xf32, #tpu.memory_space<vmem>>, %arg6: memref<32x32xf32, #tpu.memory_space<vmem>>, %arg7: memref<1x32xf32, #tpu.memory_space<vmem>>, %arg8: memref<32x4xf32, #tpu.memory_space<vmem>>, %arg9: memref<4x32xf32, #tpu.memory_space<vmem>>, %arg10: memref<2x1x32xf32, #tpu.memory_space<vmem>>) attributes {dimension_semantics = [#tpu.dimension_semantics<parallel>], iteration_bounds = array<i64: 1>, scalar_prefetch = 0 : i64, scratch_operands = 0 : i64, tpu.core_type = #tpu.core_type<tc>, window_params = [{pipeline_mode = #tpu.pipeline_mode<synchronous>, transform_indices = @transform_0, window_bounds = array<i64: 1, 32>}, {transform_indices = @transform_1, window_bounds = array<i64: 2, 8, 32>}, {transform_indices = @transform_2, window_bounds = array<i64: 2, 8, 1>}, {pipeline_mode = #tpu.pipeline_mode<synchronous>, transform_indices = @transform_3, window_bounds = array<i64: 32, 64>}, {pipeline_mode = #tpu.pipeline_mode<synchronous>, transform_indices = @transform_4, window_bounds = array<i64: 1, 64>}, {pipeline_mode = #tpu.pipeline_mode<synchronous>, transform_indices = @transform_5, window_bounds = array<i64: 32, 32>}, {pipeline_mode = #tpu.pipeline_mode<synchronous>, transform_indices = @transform_6, window_bounds = array<i64: 1, 32>}, {pipeline_mode = #tpu.pipeline_mode<synchronous>, transform_indices = @transform_7, window_bounds = array<i64: 32, 4>}, {pipeline_mode = #tpu.pipeline_mode<synchronous>, transform_indices = @transform_8, window_bounds = array<i64: 4, 32>}, {transform_indices = @transform_9, window_bounds = array<i64: 2, 1, 32>}]} {
    %c0 = arith.constant 0 : index
    %c0_0 = arith.constant 0 : index
    %c0_1 = arith.constant 0 : index
    %0 = vector.load %arg2[%c0, %c0_0, %c0_1] : memref<2x8x32xf32, #tpu.memory_space<vmem>>, vector<2x8x32xf32>
    %1 = vector.shape_cast %0 : vector<2x8x32xf32> to vector<16x32xf32>
    %c0_2 = arith.constant 0 : index
    %c0_3 = arith.constant 0 : index
    %2 = vector.load %arg4[%c0_2, %c0_3] : memref<32x64xf32, #tpu.memory_space<vmem>>, vector<32x64xf32>
    %cst = arith.constant dense<0.000000e+00> : vector<16x64xf32>
    %3 = tpu.matmul %1, %2, %cst {dimension_numbers = #tpu.dot_dimension_numbers<[1], [0], [0], [1], [0, 0, 1, 1], [], []>} : vector<16x32xf32>, vector<32x64xf32>, vector<16x64xf32> -> vector<16x64xf32>
    %c0_4 = arith.constant 0 : index
    %c0_5 = arith.constant 0 : index
    %4 = vector.load %arg5[%c0_4, %c0_5] : memref<1x64xf32, #tpu.memory_space<vmem>>, vector<1x64xf32>
    %5 = vector.broadcast %4 : vector<1x64xf32> to vector<16x64xf32>
    %6 = arith.addf %3, %5 : vector<16x64xf32>
    %7 = vector.extract_strided_slice %6 {offsets = [0, 0], sizes = [16, 32], strides = [1, 1]} : vector<16x64xf32> to vector<16x32xf32>
    %8 = vector.shape_cast %7 : vector<16x32xf32> to vector<2x8x32xf32>
    %c0_6 = arith.constant 0 : index
    %c0_7 = arith.constant 0 : index
    %c0_8 = arith.constant 0 : index
    %9 = vector.load %arg3[%c0_6, %c0_7, %c0_8] : memref<2x8x1xf32, #tpu.memory_space<vmem>>, vector<2x8x1xf32>
    %10 = vector.broadcast %9 : vector<2x8x1xf32> to vector<2x8x32xf32>
    %11 = arith.mulf %8, %10 : vector<2x8x32xf32>
    %12 = vector.extract_strided_slice %6 {offsets = [0, 32], sizes = [16, 32], strides = [1, 1]} : vector<16x64xf32> to vector<16x32xf32>
    %13 = vector.shape_cast %12 : vector<16x32xf32> to vector<2x8x32xf32>
    %c0_9 = arith.constant 0 : index
    %c0_10 = arith.constant 0 : index
    %14 = vector.load %arg1[%c0_9, %c0_10] : memref<1x32xf32, #tpu.memory_space<vmem>>, vector<1x32xf32>
    %c0_11 = arith.constant 0 : index
    %c0_12 = arith.constant 0 : index
    %15 = vector.load %arg8[%c0_11, %c0_12] : memref<32x4xf32, #tpu.memory_space<vmem>>, vector<32x4xf32>
    %c0_13 = arith.constant 0 : index
    %c0_14 = arith.constant 0 : index
    %16 = vector.load %arg9[%c0_13, %c0_14] : memref<4x32xf32, #tpu.memory_space<vmem>>, vector<4x32xf32>
    %17 = vector.shape_cast %14 : vector<1x32xf32> to vector<1x1x32xf32>
    %18 = vector.broadcast %17 : vector<1x1x32xf32> to vector<2x8x32xf32>
    %19 = arith.mulf %11, %18 : vector<2x8x32xf32>
    %20 = vector.shape_cast %19 : vector<2x8x32xf32> to vector<16x32xf32>
    %cst_15 = arith.constant dense<0.000000e+00> : vector<16x4xf32>
    %21 = tpu.matmul %20, %15, %cst_15 {dimension_numbers = #tpu.dot_dimension_numbers<[1], [0], [0], [1], [0, 0, 1, 1], [], []>} : vector<16x32xf32>, vector<32x4xf32>, vector<16x4xf32> -> vector<16x4xf32>
    %cst_16 = arith.constant 0.176776692 : f32
    %22 = vector.broadcast %cst_16 : f32 to vector<16x4xf32>
    %23 = arith.mulf %21, %22 : vector<16x4xf32>
    %24 = vector.shape_cast %23 : vector<16x4xf32> to vector<2x8x4xf32>
    %cst_17 = arith.constant dense<0xFF800000> : vector<2x4xf32>
    %25 = vector.multi_reduction <maximumf>, %24, %cst_17 [1] : vector<2x8x4xf32> to vector<2x4xf32>
    %26 = vector.shape_cast %25 : vector<2x4xf32> to vector<2x1x4xf32>
    %27 = vector.broadcast %26 : vector<2x1x4xf32> to vector<2x8x4xf32>
    %28 = arith.subf %24, %27 : vector<2x8x4xf32>
    %29 = math.exp %28 : vector<2x8x4xf32>
    %cst_18 = arith.constant dense<0.000000e+00> : vector<2x4xf32>
    %30 = vector.multi_reduction <add>, %29, %cst_18 [1] : vector<2x8x4xf32> to vector<2x4xf32>
    %31 = vector.shape_cast %30 : vector<2x4xf32> to vector<2x1x4xf32>
    %32 = vector.broadcast %31 : vector<2x1x4xf32> to vector<2x8x4xf32>
    %33 = arith.divf %29, %32 : vector<2x8x4xf32>
    %34 = vector.shape_cast %33 : vector<2x8x4xf32> to vector<16x4xf32>
    %cst_19 = arith.constant dense<0.000000e+00> : vector<16x32xf32>
    %35 = tpu.matmul %34, %16, %cst_19 {dimension_numbers = #tpu.dot_dimension_numbers<[1], [0], [0], [1], [0, 0, 1, 1], [], []>} : vector<16x4xf32>, vector<4x32xf32>, vector<16x32xf32> -> vector<16x32xf32>
    %36 = vector.shape_cast %35 : vector<16x32xf32> to vector<2x8x32xf32>
    %37 = arith.mulf %36, %13 : vector<2x8x32xf32>
    %cst_20 = arith.constant dense<0.000000e+00> : vector<2x32xf32>
    %38 = vector.multi_reduction <add>, %37, %cst_20 [1] : vector<2x8x32xf32> to vector<2x32xf32>
    %39 = vector.broadcast %14 : vector<1x32xf32> to vector<2x32xf32>
    %40 = arith.addf %39, %38 : vector<2x32xf32>
    %c0_21 = arith.constant 0 : index
    %c0_22 = arith.constant 0 : index
    %41 = vector.load %arg6[%c0_21, %c0_22] : memref<32x32xf32, #tpu.memory_space<vmem>>, vector<32x32xf32>
    %cst_23 = arith.constant dense<0.000000e+00> : vector<2x32xf32>
    %42 = tpu.matmul %40, %41, %cst_23 {dimension_numbers = #tpu.dot_dimension_numbers<[1], [0], [0], [1], [0, 0, 1, 1], [], []>} : vector<2x32xf32>, vector<32x32xf32>, vector<2x32xf32> -> vector<2x32xf32>
    %c0_24 = arith.constant 0 : index
    %c0_25 = arith.constant 0 : index
    %43 = vector.load %arg7[%c0_24, %c0_25] : memref<1x32xf32, #tpu.memory_space<vmem>>, vector<1x32xf32>
    %44 = vector.broadcast %43 : vector<1x32xf32> to vector<2x32xf32>
    %45 = arith.addf %42, %44 : vector<2x32xf32>
    %cst_26 = arith.constant 0.000000e+00 : f32
    %46 = vector.broadcast %cst_26 : f32 to vector<2x32xf32>
    %47 = arith.maximumf %45, %46 : vector<2x32xf32>
    %48 = arith.addf %40, %47 : vector<2x32xf32>
    %c0_27 = arith.constant 0 : index
    %c0_28 = arith.constant 0 : index
    %c0_29 = arith.constant 0 : index
    %49 = vector.load %arg10[%c0_27, %c0_28, %c0_29] : memref<2x1x32xf32, #tpu.memory_space<vmem>>, vector<2x1x32xf32>
    %50 = vector.shape_cast %49 : vector<2x1x32xf32> to vector<2x32xf32>
    %51 = vector.shape_cast %48 : vector<2x32xf32> to vector<2x1x32xf32>
    tpu.vector_store %arg10[%c0_27, %c0_28, %c0_29], %51 {strides = array<i32>} : memref<2x1x32xf32, #tpu.memory_space<vmem>>, vector<2x1x32xf32>,
    return
  }
  func.func @transform_0(%arg0: i32) -> (i32, i32) {
    %c0_i32 = arith.constant 0 : i32
    %c0_i32_0 = arith.constant 0 : i32
    %c0_i32_1 = arith.constant 0 : i32
    return %c0_i32, %c0_i32_0 : i32, i32
  }
  func.func @transform_1(%arg0: i32) -> (i32, i32, i32) {
    %c0_i32 = arith.constant 0 : i32
    %c0_i32_0 = arith.constant 0 : i32
    %c0_i32_1 = arith.constant 0 : i32
    return %arg0, %c0_i32, %c0_i32_0 : i32, i32, i32
  }
  func.func @transform_2(%arg0: i32) -> (i32, i32, i32) {
    %c0_i32 = arith.constant 0 : i32
    %c0_i32_0 = arith.constant 0 : i32
    %c0_i32_1 = arith.constant 0 : i32
    return %arg0, %c0_i32, %c0_i32_0 : i32, i32, i32
  }
  func.func @transform_3(%arg0: i32) -> (i32, i32) {
    %c0_i32 = arith.constant 0 : i32
    %c0_i32_0 = arith.constant 0 : i32
    %c0_i32_1 = arith.constant 0 : i32
    return %c0_i32, %c0_i32_0 : i32, i32
  }
  func.func @transform_4(%arg0: i32) -> (i32, i32) {
    %c0_i32 = arith.constant 0 : i32
    %c0_i32_0 = arith.constant 0 : i32
    %c0_i32_1 = arith.constant 0 : i32
    return %c0_i32, %c0_i32_0 : i32, i32
  }
  func.func @transform_5(%arg0: i32) -> (i32, i32) {
    %c0_i32 = arith.constant 0 : i32
    %c0_i32_0 = arith.constant 0 : i32
    %c0_i32_1 = arith.constant 0 : i32
    return %c0_i32, %c0_i32_0 : i32, i32
  }
  func.func @transform_6(%arg0: i32) -> (i32, i32) {
    %c0_i32 = arith.constant 0 : i32
    %c0_i32_0 = arith.constant 0 : i32
    %c0_i32_1 = arith.constant 0 : i32
    return %c0_i32, %c0_i32_0 : i32, i32
  }
  func.func @transform_7(%arg0: i32) -> (i32, i32) {
    %c0_i32 = arith.constant 0 : i32
    %c0_i32_0 = arith.constant 0 : i32
    %c0_i32_1 = arith.constant 0 : i32
    return %c0_i32, %c0_i32_0 : i32, i32
  }
  func.func @transform_8(%arg0: i32) -> (i32, i32) {
    %c0_i32 = arith.constant 0 : i32
    %c0_i32_0 = arith.constant 0 : i32
    %c0_i32_1 = arith.constant 0 : i32
    return %c0_i32, %c0_i32_0 : i32, i32
  }
  func.func @transform_9(%arg0: i32) -> (i32, i32, i32) {
    %c0_i32 = arith.constant 0 : i32
    %c0_i32_0 = arith.constant 0 : i32
    %c0_i32_1 = arith.constant 0 : i32
    return %arg0, %c0_i32, %c0_i32_0 : i32, i32, i32
  }
}

</mosaic_0001>

<bundles_post_ra>
// kernel: tpu_custom_call.1
= control target key start
LH: loop header
LB: loop body
LE: loop exit
PB: predicated region body
PF: predicated region fallthrough
CT: control target
= control target key end

     0   :  { %14 = vsyncpa [#allocation3], 0  ;;  %s584_s0 = inlined_call_operand.vmem [shape: f32[1,32], index: 0, kind: input, shape index: {}]   ;;  %s585_s1 = inlined_call_operand.vmem [shape: f32[2,8,32], index: 1, kind: input, shape index: {}]   ;;  %s586_s2 = inlined_call_operand.vmem [shape: f32[2,8,1], index: 2, kind: input, shape index: {}]   ;;  %s587_s3 = inlined_call_operand.vmem [shape: f32[32,64], index: 3, kind: input, shape index: {}]   ;;  %s588_s4 = inlined_call_operand.hbm [shape: f32[1,64], index: 4, kind: input, shape index: {}]   ;;  %s589_s5 = inlined_call_operand.hbm [shape: f32[32,32], index: 5, kind: input, shape index: {}]   ;;  %s590_s6 = inlined_call_operand.vmem [shape: f32[1,32], index: 6, kind: input, shape index: {}]   ;;  %s591_s7 = inlined_call_operand.vmem [shape: f32[32,4], index: 7, kind: input, shape index: {}]   ;;  %s592_s8 = inlined_call_operand.vmem [shape: f32[4,32], index: 8, kind: input, shape index: {}]   ;;  %s593_s9 = inlined_call_operand.hbm [shape: f32[2,1,32], index: 9, kind: output, shape index: {}]  }
   0x1   :  { %15 = vsyncpa [#allocation6], 0 }
   0x2   :  { %16 = vsyncpa [#allocation4], 0  ;;  %s30_s11 = sshll.u32 %s588_s4, 4  ;;  %s453_s12 = smov [#allocation2]   ;;  %s31_s11 = int_to_ptr.hbm [resolvable:$true] %s30_s11 }
   0x3   :  { %s32_s13 = sshll.u32 %s453_s12, 4  ;;  %s40_s16 = sshll.u32 %s589_s5, 4  ;;  %s33_s13 = int_to_ptr.vmem [resolvable:$true] %s32_s13  ;;  %s41_s16 = int_to_ptr.hbm [resolvable:$true] %s40_s16 }
   0x4   :  { %35 = dma.hbm_to_vmem [thread:$0]  %s31_s11, 16, %s33_s13, [#allocation3]  }
   0x5   :  { %s454_s17 = smov [#allocation5]   ;;  %s455_s19 = smov 128  }
   0x6   :  { %s42_s18 = sshll.u32 %s454_s17, 4  ;;  %s456_s20 = smov 8   ;;  %s43_s18 = int_to_ptr.vmem [resolvable:$true] %s42_s18 }
   0x7   :  { %48 = dma.hbm_to_vmem [thread:$0]  %s41_s16, 512, %s43_s18, [#allocation6], %s455_s19, %s455_s19, %s456_s20  }
   0x8   :  { %447 = dma.done.wait [#allocation3], 16  }
   0x9   :  { %448 = vsyncadd [#allocation3], 4294967280 }
   0xa   :  { %449 = dma.done.wait [#allocation6], 512  }
   0xb   :  { %450 = vsyncadd [#allocation6], 4294966784  ;;  %v457_v0 = vmov 0   ;;  %v68_v1 = vld [vmem:[%s587_s3 + $0x18] sm:$0xff]  ;;  %v67_v2 = vld [vmem:[%s587_s3 + $0x10] sm:$0xff]  ;;  %vm73_vm0 = vcmask 261120  }
   0xc   :  { %363 = vset.pattern.permute.xlu0 %v457_v0  ;;  %92 = vmatpush.msra.mxu0 %v68_v1  ;;  %v103_v3 = vld [vmem:[%s586_s2] sm:$0xff]  ;;  %v66_v4 = vld [vmem:[%s587_s3 + $0x8] sm:$0xff]  ;;  %v121_v9 = vld [vmem:[%s591_s7 + $0x18] sm:$0xff]  ;;  %s458_s4 = smov 96   ;;  %vm159_vm1 = vcmask 31744   ;;  %vm230_vm2 = vcmask 1043456  }
   0xd   :  { %107 = vperm.xlu0 %363, %v103_v3   ;;  %v65_v5 = vld [vmem:[%s587_s3] sm:$0xff]  ;;  %v104_v7 = vld [vmem:[%s586_s2 + $0x8] sm:$0xff]  ;;  %146 = vmatpush.msra.mxu1 %v121_v9  ;;  %v120_v10 = vld [vmem:[%s591_s7 + $0x10] sm:$0xff]  ;;  %vm283_vm11 = vcmask 1041409   ;;  %s459_s22 = smov [#allocation7]   ;;  %s332_s25 = sshll.u32 %s593_s9, 4  ;;  %s333_s25 = int_to_ptr.hbm [resolvable:$true] %s332_s25 }
   0xe   :  { %93 = vmatpush.msra.mxu0 %v67_v2  ;;  %v63_v6 = vld [vmem:[%s585_s1] sm:$0xff]  ;;  %v64_v8 = vld [vmem:[%s585_s1 + $0x8] sm:$0xff]  ;;  %s330_s5 = sshll.u32 %s459_s22, 4  ;;  %vm323_vm12 = vcmask 253952   ;;  %s460_s26 = smov 16   ;;  %s331_s5 = int_to_ptr.vmem [resolvable:$true] %s330_s5 }
   0xf   :  { %147 = vmatpush.msra.mxu1 %v120_v10  ;;  %v119_v11 = vld [vmem:[%s591_s7 + $0x8] sm:$0xff]  ;;  %v118_v12 = vld [vmem:[%s591_s7] sm:$0xff]  ;;  %s461_s27 = smov 1  }
  0x10   :  { %94 = vmatpush.msra.mxu0 %v66_v4  ;;  %v364_v13 = vld [vmem:[#allocation2] ss:$0 sm:$0xff] }
  0x11   :  { %148 = vmatpush.msra.mxu1 %v119_v11  ;;  %v559_v17 = vld [vmem:[%s584_s0] ss:$0 sm:$0xff] }
  0x12   :  { %95 = vmatpush.msra.mxu0 %v65_v5  ;;  %v122_v41 = vld [vmem:[%s592_s8] sm:$0xf] }
  0x13   :  { %346 = vmatmul.msk.f32.vlgmr.msra.gmra.mxu0 %vm73_vm0, %v63_v6  ;;  %149 = vmatpush.msra.mxu1 %v118_v12 }
  0x14   :  { %350 = vmatpush.msk.msra.mxu2 %vm230_vm2, %v122_v41 }
  0x15   :  { %112 = vperm.xlu0 %363, %v104_v7  }
  0x1b   :  { %347 = vmatmul.msk.f32.gmra.mxu0 %vm73_vm0, %v64_v8 }
  0x7f   :  { %v108_v14 = vpop.permute.xlu0 %107 }
  0x87   :  { %v113_v22 = vpop.permute.xlu0 %112 }
  0x90   :  { %v97_v15 = vpop.f32.mrf.mxu0 }
  0x91   :  { %v98_v16 = vadd.f32 %v364_v13, %v97_v15 }
  0x93   :  { %v115_v18 = vmul.f32 %v108_v14, %v98_v16  ;;  %259 = vrot.lane.b32.xlu1 %v98_v16, %s458_s4 }
  0x95   :  { %v126_v19 = vmul.f32 %v559_v17, %v115_v18 }
  0x97   :  { %348 = vmatmul.msk.f32.vlgmr.msra.gmra.mxu1 %vm73_vm0, %v126_v19 }
  0x98   :  { %v100_v20 = vpop.f32.mrf.mxu0 }
  0x99   :  { %v101_v21 = vadd.f32 %v364_v13, %v100_v20 }
  0x9b   :  { %v116_v23 = vmul.f32 %v113_v22, %v101_v21  ;;  %261 = vrot.lane.b32.xlu1 %v101_v21, %s458_s4 }
  0x9d   :  { %v127_v24 = vmul.f32 %v559_v17, %v116_v23  ;;  %v290_v23 = vld [vmem:[#allocation5 + $0x18] sm:$0xff] }
  0x9e   :  { %310 = vmatpush.msra.mxu3 %v290_v23 }
  0x9f   :  { %349 = vmatmul.msk.f32.gmra.mxu1 %vm73_vm0, %v127_v24  ;;  %v289_v24 = vld [vmem:[#allocation5 + $0x10] sm:$0xff] }
  0xa0   :  { %311 = vmatpush.msra.mxu3 %v289_v24 }
 0x114   :  { %v151_v25 = vpop.f32.mrf.mxu1 }
 0x115   :  { %v157_v26 = vmul.f32 0.17677669, %v151_v25  ;;  %v288_v25 = vld [vmem:[#allocation5 + $0x8] sm:$0xff] }
 0x116   :  { %312 = vmatpush.msra.mxu3 %v288_v25 }
 0x117   :  { %v160_v27 = vsel %vm159_vm1, %v157_v26, -inf }
 0x118   :  { %v161_v28 = vrot.slane %v160_v27, 4 }
 0x11a   :  { %v162_v29 = vmax.f32 %v160_v27, %v161_v28  ;;  %v260_v27 = vpop.permute.xlu1 %259 }
 0x11c   :  { %v163_v30 = vrot.slane %v162_v29, 2  ;;  %v154_v31 = vpop.f32.mrf.mxu1 }
 0x11d   :  { %v158_v32 = vmul.f32 0.17677669, %v154_v31 }
 0x11e   :  { %v164_v33 = vmax.f32 %v162_v29, %v163_v30 }
 0x11f   :  { %v167_v34 = vsel %vm159_vm1, %v158_v32, -inf }
 0x120   :  { %v165_v35 = vrot.slane %v164_v33, 1  ;;  %v168_v36 = vrot.slane %v167_v34, 4 }
 0x122   :  { %v166_v37 = vmax.f32 %v164_v33, %v165_v35  ;;  %v169_v38 = vmax.f32 %v167_v34, %v168_v36  ;;  %v262_v33 = vpop.permute.xlu1 %261 }
 0x124   :  { %v174_v39 = vsub.f32 %v157_v26, %v166_v37  ;;  %v170_v40 = vrot.slane %v169_v38, 2  ;;  %v287_v26 = vld [vmem:[#allocation5] sm:$0xff] }
 0x125   :  { %313 = vmatpush.msra.mxu3 %v287_v26 }
 0x126   :  { %v176_v42 = vmul.f32 1.442695, %v174_v39  ;;  %v171_v43 = vmax.f32 %v169_v38, %v170_v40 }
 0x128   :  { %367 = vpow2.f32 %v176_v42  ;;  %v172_v44 = vrot.slane %v171_v43, 1 }
 0x12a   :  { %v173_v45 = vmax.f32 %v171_v43, %v172_v44 }
 0x12c   :  { %v175_v46 = vsub.f32 %v158_v32, %v173_v45 }
 0x12e   :  { %v368_v47 = vpop.eup %367  ;;  %v178_v48 = vmul.f32 1.442695, %v175_v46 }
 0x12f   :  { %v180_v49 = vsel %vm159_vm1, %v368_v47, 0.0 }
 0x130   :  { %v181_v50 = vrot.slane %v180_v49, 4  ;;  %369 = vpow2.f32 %v178_v48 }
 0x132   :  { %v182_v51 = vadd.f32 %v181_v50, %v180_v49  ;;  %v366_v49 = vld [vmem:[%s590_s6] ss:$0 sm:$0xff] }
 0x134   :  { %v183_v52 = vrot.slane %v182_v51, 2 }
 0x136   :  { %v370_v53 = vpop.eup %369  ;;  %v184_v54 = vadd.f32 %v183_v52, %v182_v51 }
 0x137   :  { %v187_v55 = vsel %vm159_vm1, %v370_v53, 0.0 }
 0x138   :  { %v185_v56 = vrot.slane %v184_v54, 1  ;;  %v188_v57 = vrot.slane %v187_v55, 4 }
 0x13a   :  { %v186_v58 = vadd.f32 %v185_v56, %v184_v54  ;;  %v189_v59 = vadd.f32 %v188_v57, %v187_v55 }
 0x13c   :  { %371 = vrcp.f32 %v186_v58  ;;  %v190_v60 = vrot.slane %v189_v59, 2  ;;  %v205_v3 = vand.u32 2147483648, %v186_v58  ;;  %v203_v5 = vand.u32 2147483647, %v186_v58 }
 0x13d   :  { %vm199_vm4 = vweird.f32 %v186_v58 }
 0x13e   :  { %v191_v61 = vadd.f32 %v190_v60, %v189_v59  ;;  %v206_v8 = vor.u32 1.1754944e-38, %v205_v3  ;;  %vm204_vm6 = vcmp.eq.f32.partialorder %v203_v5, 8.507059e+37 }
 0x140   :  { %v192_v62 = vrot.slane %v191_v61, 1 }
 0x142   :  { %v372_v63 = vpop.eup %371  ;;  %v193_v0 = vadd.f32 %v192_v62, %v191_v61 }
 0x143   :  { %v195_v1 = vmul.f32 %v372_v63, %v186_v58  ;;  %vm200_vm3 = vweird.f32 %v372_v63 }
 0x144   :  { %373 = vrcp.f32 %v193_v0  ;;  %vm201_vm5 = vmor %vm199_vm4, %vm200_vm3  ;;  %v220_v14 = vand.u32 2147483648, %v193_v0  ;;  %v218_v16 = vand.u32 2147483647, %v193_v0  ;;  %vm214_vm8 = vweird.f32 %v193_v0 }
 0x145   :  { %v196_v2 = vsub.f32 1.0, %v195_v1 }
 0x146   :  { %v221_v19 = vor.u32 1.1754944e-38, %v220_v14  ;;  %vm219_vm10 = vcmp.eq.f32.partialorder %v218_v16, 8.507059e+37 }
 0x147   :  { %v197_v4 = vmul.f32 %v372_v63, %v196_v2 }
 0x149   :  { %v198_v6 = vadd.f32 %v372_v63, %v197_v4 }
 0x14a   :  { %v374_v7 = vpop.eup %373 }
 0x14b   :  { %v202_v9 = vsel %vm201_vm5, %v372_v63, %v198_v6  ;;  %v210_v10 = vmul.f32 %v374_v7, %v193_v0  ;;  %vm215_vm7 = vweird.f32 %v374_v7 }
 0x14c   :  { %v207_v11 = vsel %vm204_vm6, %v206_v8, %v202_v9  ;;  %vm216_vm9 = vmor %vm214_vm8, %vm215_vm7 }
 0x14d   :  { %v208_v12 = vmul.f32 %v368_v47, %v207_v11  ;;  %v211_v13 = vsub.f32 1.0, %v210_v10 }
 0x14f   :  { %351 = vmatmul.msk.f32.vlgmr.msra.gmra.mxu2 %vm159_vm1, %v208_v12  ;;  %v212_v15 = vmul.f32 %v374_v7, %v211_v13 }
 0x151   :  { %v213_v18 = vadd.f32 %v374_v7, %v212_v15 }
 0x153   :  { %v217_v20 = vsel %vm216_vm9, %v374_v7, %v213_v18 }
 0x154   :  { %v222_v21 = vsel %vm219_vm10, %v221_v19, %v217_v20 }
 0x155   :  { %v223_v22 = vmul.f32 %v370_v53, %v222_v21 }
 0x157   :  { %352 = vmatmul.msk.f32.gmra.mxu2 %vm159_vm1, %v223_v22 }
 0x1d2   :  { %v251_v28 = vpop.f32.mrf.mxu2 }
 0x1d3   :  { %v265_v29 = vmul.f32 %v260_v27, %v251_v28 }
 0x1d5   :  { %v267_v30 = vsel %vm73_vm0, %v265_v29, 0.0 }
 0x1d6   :  { %v268_v31 = vrot.slane %v267_v30, 4 }
 0x1d8   :  { %v269_v32 = vadd.f32 %v268_v31, %v267_v30 }
 0x1da   :  { %v254_v34 = vpop.f32.mrf.mxu2  ;;  %v270_v36 = vrot.slane %v269_v32, 2 }
 0x1db   :  { %v266_v35 = vmul.f32 %v262_v33, %v254_v34 }
 0x1dc   :  { %v271_v39 = vadd.f32 %v270_v36, %v269_v32 }
 0x1dd   :  { %v274_v37 = vsel %vm73_vm0, %v266_v35, 0.0 }
 0x1de   :  { %v275_v38 = vrot.slane %v274_v37, 4  ;;  %v272_v42 = vrot.slane %v271_v39, 1 }
 0x1e0   :  { %v276_v40 = vadd.f32 %v275_v38, %v274_v37  ;;  %v273_v45 = vadd.f32 %v272_v42, %v271_v39 }
 0x1e2   :  { %v277_v41 = vrot.slane %v276_v40, 2 }
 0x1e4   :  { %v278_v43 = vadd.f32 %v277_v41, %v276_v40 }
 0x1e6   :  { %v279_v44 = vrot.slane %v278_v43, 1 }
 0x1e8   :  { %v280_v46 = vadd.f32 %v279_v44, %v278_v43 }
 0x1ea   :  { %v284_v47 = vsel %vm283_vm11, %v280_v46, %v273_v45 }
 0x1eb   :  { %v286_v48 = vadd.f32 %v559_v17, %v284_v47 }
 0x1ed   :  { %353 = vmatmul.msk.f32.vlgmr.msra.gmra.mxu3 %vm73_vm0, %v286_v48 }
 0x270   :  { %v315_v50 = vpop.f32.mrf.mxu3 }
 0x271   :  { %v316_v51 = vadd.f32 %v366_v49, %v315_v50 }
 0x273   :  { %v318_v52 = vmax.f32 %v316_v51, 0.0 }
 0x275   :  { %v319_v53 = vadd.f32 %v318_v52, %v286_v48 }
 0x277   :  { %v321_v17 = vrot.slane %v319_v53, 1  ;;  %324 = vst.msk [vmem:[#allocation7] sm:$0x1] %vm323_vm12, %v319_v53 }
 0x279   :  { %325 = vst.msk [vmem:[#allocation7 + $0x1] sm:$0x1] %vm323_vm12, %v321_v17 }
 0x27a   :  { %338 = dma.vmem_to_hbm [thread:$0]  %s331_s5, 32, %s333_s25, [#allocation4], %s460_s26, %s460_s26, %s461_s27  }
 0x27b   :  { %451 = dma.done.wait [#allocation4], 32  }
 0x27c   :  { %452 = vsyncadd [#allocation4], 4294967264 }
 0x27d   :  { %343 = vsyncpa [#allocation3], 1 }
 0x27e   :  { %344 = vsyncpa [#allocation6], 1 }
 0x27f   :  { %345 = vsyncpa [#allocation4], 1 }

// kernel: tpu_custom_call.1
= control target key start
LH: loop header
LB: loop body
LE: loop exit
PB: predicated region body
PF: predicated region fallthrough
CT: control target
= control target key end

     0   :  { %14 = vsyncpa [#allocation3], 0  ;;  %s584_s0 = inlined_call_operand.vmem [shape: f32[1,32], index: 0, kind: input, shape index: {}]   ;;  %s585_s1 = inlined_call_operand.vmem [shape: f32[2,8,32], index: 1, kind: input, shape index: {}]   ;;  %s586_s2 = inlined_call_operand.vmem [shape: f32[2,8,1], index: 2, kind: input, shape index: {}]   ;;  %s587_s3 = inlined_call_operand.vmem [shape: f32[32,64], index: 3, kind: input, shape index: {}]   ;;  %s588_s4 = inlined_call_operand.hbm [shape: f32[1,64], index: 4, kind: input, shape index: {}]   ;;  %s589_s5 = inlined_call_operand.hbm [shape: f32[32,32], index: 5, kind: input, shape index: {}]   ;;  %s590_s6 = inlined_call_operand.vmem [shape: f32[1,32], index: 6, kind: input, shape index: {}]   ;;  %s591_s7 = inlined_call_operand.vmem [shape: f32[32,4], index: 7, kind: input, shape index: {}]   ;;  %s592_s8 = inlined_call_operand.vmem [shape: f32[4,32], index: 8, kind: input, shape index: {}]   ;;  %s593_s9 = inlined_call_operand.hbm [shape: f32[2,1,32], index: 9, kind: output, shape index: {}]  }
   0x1   :  { %15 = vsyncpa [#allocation6], 0 }
   0x2   :  { %16 = vsyncpa [#allocation4], 0  ;;  %s30_s11 = sshll.u32 %s588_s4, 4  ;;  %s453_s12 = smov [#allocation2]   ;;  %s31_s11 = int_to_ptr.hbm [resolvable:$true] %s30_s11 }
   0x3   :  { %s32_s13 = sshll.u32 %s453_s12, 4  ;;  %s40_s16 = sshll.u32 %s589_s5, 4  ;;  %s33_s13 = int_to_ptr.vmem [resolvable:$true] %s32_s13  ;;  %s41_s16 = int_to_ptr.hbm [resolvable:$true] %s40_s16 }
   0x4   :  { %35 = dma.hbm_to_vmem [thread:$0]  %s31_s11, 16, %s33_s13, [#allocation3]  }
   0x5   :  { %s454_s17 = smov [#allocation5]   ;;  %s455_s19 = smov 128  }
   0x6   :  { %s42_s18 = sshll.u32 %s454_s17, 4  ;;  %s456_s20 = smov 8   ;;  %s43_s18 = int_to_ptr.vmem [resolvable:$true] %s42_s18 }
   0x7   :  { %48 = dma.hbm_to_vmem [thread:$0]  %s41_s16, 512, %s43_s18, [#allocation6], %s455_s19, %s455_s19, %s456_s20  }
   0x8   :  { %447 = dma.done.wait [#allocation3], 16  }
   0x9   :  { %448 = vsyncadd [#allocation3], 4294967280 }
   0xa   :  { %449 = dma.done.wait [#allocation6], 512  }
   0xb   :  { %450 = vsyncadd [#allocation6], 4294966784  ;;  %v457_v0 = vmov 0   ;;  %v68_v1 = vld [vmem:[%s587_s3 + $0x18] sm:$0xff]  ;;  %v67_v2 = vld [vmem:[%s587_s3 + $0x10] sm:$0xff]  ;;  %vm73_vm0 = vcmask 261120  }
   0xc   :  { %363 = vset.pattern.permute.xlu0 %v457_v0  ;;  %92 = vmatpush.msra.mxu0 %v68_v1  ;;  %v103_v3 = vld [vmem:[%s586_s2] sm:$0xff]  ;;  %v66_v4 = vld [vmem:[%s587_s3 + $0x8] sm:$0xff]  ;;  %v121_v9 = vld [vmem:[%s591_s7 + $0x18] sm:$0xff]  ;;  %s458_s4 = smov 96   ;;  %vm159_vm1 = vcmask 31744   ;;  %vm230_vm2 = vcmask 1043456  }
   0xd   :  { %107 = vperm.xlu0 %363, %v103_v3   ;;  %v65_v5 = vld [vmem:[%s587_s3] sm:$0xff]  ;;  %v104_v7 = vld [vmem:[%s586_s2 + $0x8] sm:$0xff]  ;;  %146 = vmatpush.msra.mxu1 %v121_v9  ;;  %v120_v10 = vld [vmem:[%s591_s7 + $0x10] sm:$0xff]  ;;  %vm283_vm11 = vcmask 1041409   ;;  %s459_s22 = smov [#allocation7]   ;;  %s332_s25 = sshll.u32 %s593_s9, 4  ;;  %s333_s25 = int_to_ptr.hbm [resolvable:$true] %s332_s25 }
   0xe   :  { %93 = vmatpush.msra.mxu0 %v67_v2  ;;  %v63_v6 = vld [vmem:[%s585_s1] sm:$0xff]  ;;  %v64_v8 = vld [vmem:[%s585_s1 + $0x8] sm:$0xff]  ;;  %s330_s5 = sshll.u32 %s459_s22, 4  ;;  %vm323_vm12 = vcmask 253952   ;;  %s460_s26 = smov 16   ;;  %s331_s5 = int_to_ptr.vmem [resolvable:$true] %s330_s5 }
   0xf   :  { %147 = vmatpush.msra.mxu1 %v120_v10  ;;  %v119_v11 = vld [vmem:[%s591_s7 + $0x8] sm:$0xff]  ;;  %v118_v12 = vld [vmem:[%s591_s7] sm:$0xff]  ;;  %s461_s27 = smov 1  }
  0x10   :  { %94 = vmatpush.msra.mxu0 %v66_v4  ;;  %v364_v13 = vld [vmem:[#allocation2] ss:$0 sm:$0xff] }
  0x11   :  { %148 = vmatpush.msra.mxu1 %v119_v11  ;;  %v559_v17 = vld [vmem:[%s584_s0] ss:$0 sm:$0xff] }
  0x12   :  { %95 = vmatpush.msra.mxu0 %v65_v5  ;;  %v122_v41 = vld [vmem:[%s592_s8] sm:$0xf] }
  0x13   :  { %346 = vmatmul.msk.f32.vlgmr.msra.gmra.mxu0 %vm73_vm0, %v63_v6  ;;  %149 = vmatpush.msra.mxu1 %v118_v12 }
  0x14   :  { %350 = vmatpush.msk.msra.mxu2 %vm230_vm2, %v122_v41 }
  0x15   :  { %112 = vperm.xlu0 %363, %v104_v7  }
  0x1b   :  { %347 = vmatmul.msk.f32.gmra.mxu0 %vm73_vm0, %v64_v8 }
  0x7f   :  { %v108_v14 = vpop.permute.xlu0 %107 }
  0x87   :  { %v113_v22 = vpop.permute.xlu0 %112 }
  0x90   :  { %v97_v15 = vpop.f32.mrf.mxu0 }
  0x91   :  { %v98_v16 = vadd.f32 %v364_v13, %v97_v15 }
  0x93   :  { %v115_v18 = vmul.f32 %v108_v14, %v98_v16  ;;  %259 = vrot.lane.b32.xlu1 %v98_v16, %s458_s4 }
  0x95   :  { %v126_v19 = vmul.f32 %v559_v17, %v115_v18 }
  0x97   :  { %348 = vmatmul.msk.f32.vlgmr.msra.gmra.mxu1 %vm73_vm0, %v126_v19 }
  0x98   :  { %v100_v20 = vpop.f32.mrf.mxu0 }
  0x99   :  { %v101_v21 = vadd.f32 %v364_v13, %v100_v20 }
  0x9b   :  { %v116_v23 = vmul.f32 %v113_v22, %v101_v21  ;;  %261 = vrot.lane.b32.xlu1 %v101_v21, %s458_s4 }
  0x9d   :  { %v127_v24 = vmul.f32 %v559_v17, %v116_v23  ;;  %v290_v23 = vld [vmem:[#allocation5 + $0x18] sm:$0xff] }
  0x9e   :  { %310 = vmatpush.msra.mxu3 %v290_v23 }
  0x9f   :  { %349 = vmatmul.msk.f32.gmra.mxu1 %vm73_vm0, %v127_v24  ;;  %v289_v24 = vld [vmem:[#allocation5 + $0x10] sm:$0xff] }
  0xa0   :  { %311 = vmatpush.msra.mxu3 %v289_v24 }
 0x114   :  { %v151_v25 = vpop.f32.mrf.mxu1 }
 0x115   :  { %v157_v26 = vmul.f32 0.17677669, %v151_v25  ;;  %v288_v25 = vld [vmem:[#allocation5 + $0x8] sm:$0xff] }
 0x116   :  { %312 = vmatpush.msra.mxu3 %v288_v25 }
 0x117   :  { %v160_v27 = vsel %vm159_vm1, %v157_v26, -inf }
 0x118   :  { %v161_v28 = vrot.slane %v160_v27, 4 }
 0x11a   :  { %v162_v29 = vmax.f32 %v160_v27, %v161_v28  ;;  %v260_v27 = vpop.permute.xlu1 %259 }
 0x11c   :  { %v163_v30 = vrot.slane %v162_v29, 2  ;;  %v154_v31 = vpop.f32.mrf.mxu1 }
 0x11d   :  { %v158_v32 = vmul.f32 0.17677669, %v154_v31 }
 0x11e   :  { %v164_v33 = vmax.f32 %v162_v29, %v163_v30 }
 0x11f   :  { %v167_v34 = vsel %vm159_vm1, %v158_v32, -inf }
 0x120   :  { %v165_v35 = vrot.slane %v164_v33, 1  ;;  %v168_v36 = vrot.slane %v167_v34, 4 }
 0x122   :  { %v166_v37 = vmax.f32 %v164_v33, %v165_v35  ;;  %v169_v38 = vmax.f32 %v167_v34, %v168_v36  ;;  %v262_v33 = vpop.permute.xlu1 %261 }
 0x124   :  { %v174_v39 = vsub.f32 %v157_v26, %v166_v37  ;;  %v170_v40 = vrot.slane %v169_v38, 2  ;;  %v287_v26 = vld [vmem:[#allocation5] sm:$0xff] }
 0x125   :  { %313 = vmatpush.msra.mxu3 %v287_v26 }
 0x126   :  { %v176_v42 = vmul.f32 1.442695, %v174_v39  ;;  %v171_v43 = vmax.f32 %v169_v38, %v170_v40 }
 0x128   :  { %367 = vpow2.f32 %v176_v42  ;;  %v172_v44 = vrot.slane %v171_v43, 1 }
 0x12a   :  { %v173_v45 = vmax.f32 %v171_v43, %v172_v44 }
 0x12c   :  { %v175_v46 = vsub.f32 %v158_v32, %v173_v45 }
 0x12e   :  { %v368_v47 = vpop.eup %367  ;;  %v178_v48 = vmul.f32 1.442695, %v175_v46 }
 0x12f   :  { %v180_v49 = vsel %vm159_vm1, %v368_v47, 0.0 }
 0x130   :  { %v181_v50 = vrot.slane %v180_v49, 4  ;;  %369 = vpow2.f32 %v178_v48 }
 0x132   :  { %v182_v51 = vadd.f32 %v181_v50, %v180_v49  ;;  %v366_v49 = vld [vmem:[%s590_s6] ss:$0 sm:$0xff] }
 0x134   :  { %v183_v52 = vrot.slane %v182_v51, 2 }
 0x136   :  { %v370_v53 = vpop.eup %369  ;;  %v184_v54 = vadd.f32 %v183_v52, %v182_v51 }
 0x137   :  { %v187_v55 = vsel %vm159_vm1, %v370_v53, 0.0 }
 0x138   :  { %v185_v56 = vrot.slane %v184_v54, 1  ;;  %v188_v57 = vrot.slane %v187_v55, 4 }
 0x13a   :  { %v186_v58 = vadd.f32 %v185_v56, %v184_v54  ;;  %v189_v59 = vadd.f32 %v188_v57, %v187_v55 }
 0x13c   :  { %371 = vrcp.f32 %v186_v58  ;;  %v190_v60 = vrot.slane %v189_v59, 2  ;;  %v205_v3 = vand.u32 2147483648, %v186_v58  ;;  %v203_v5 = vand.u32 2147483647, %v186_v58 }
 0x13d   :  { %vm199_vm4 = vweird.f32 %v186_v58 }
 0x13e   :  { %v191_v61 = vadd.f32 %v190_v60, %v189_v59  ;;  %v206_v8 = vor.u32 1.1754944e-38, %v205_v3  ;;  %vm204_vm6 = vcmp.eq.f32.partialorder %v203_v5, 8.507059e+37 }
 0x140   :  { %v192_v62 = vrot.slane %v191_v61, 1 }
 0x142   :  { %v372_v63 = vpop.eup %371  ;;  %v193_v0 = vadd.f32 %v192_v62, %v191_v61 }
 0x143   :  { %v195_v1 = vmul.f32 %v372_v63, %v186_v58  ;;  %vm200_vm3 = vweird.f32 %v372_v63 }
 0x144   :  { %373 = vrcp.f32 %v193_v0  ;;  %vm201_vm5 = vmor %vm199_vm4, %vm200_vm3  ;;  %v220_v14 = vand.u32 2147483648, %v193_v0  ;;  %v218_v16 = vand.u32 2147483647, %v193_v0  ;;  %vm214_vm8 = vweird.f32 %v193_v0 }
 0x145   :  { %v196_v2 = vsub.f32 1.0, %v195_v1 }
 0x146   :  { %v221_v19 = vor.u32 1.1754944e-38, %v220_v14  ;;  %vm219_vm10 = vcmp.eq.f32.partialorder %v218_v16, 8.507059e+37 }
 0x147   :  { %v197_v4 = vmul.f32 %v372_v63, %v196_v2 }
 0x149   :  { %v198_v6 = vadd.f32 %v372_v63, %v197_v4 }
 0x14a   :  { %v374_v7 = vpop.eup %373 }
 0x14b   :  { %v202_v9 = vsel %vm201_vm5, %v372_v63, %v198_v6  ;;  %v210_v10 = vmul.f32 %v374_v7, %v193_v0  ;;  %vm215_vm7 = vweird.f32 %v374_v7 }
 0x14c   :  { %v207_v11 = vsel %vm204_vm6, %v206_v8, %v202_v9  ;;  %vm216_vm9 = vmor %vm214_vm8, %vm215_vm7 }
 0x14d   :  { %v208_v12 = vmul.f32 %v368_v47, %v207_v11  ;;  %v211_v13 = vsub.f32 1.0, %v210_v10 }
 0x14f   :  { %351 = vmatmul.msk.f32.vlgmr.msra.gmra.mxu2 %vm159_vm1, %v208_v12  ;;  %v212_v15 = vmul.f32 %v374_v7, %v211_v13 }
 0x151   :  { %v213_v18 = vadd.f32 %v374_v7, %v212_v15 }
 0x153   :  { %v217_v20 = vsel %vm216_vm9, %v374_v7, %v213_v18 }
 0x154   :  { %v222_v21 = vsel %vm219_vm10, %v221_v19, %v217_v20 }
 0x155   :  { %v223_v22 = vmul.f32 %v370_v53, %v222_v21 }
 0x157   :  { %352 = vmatmul.msk.f32.gmra.mxu2 %vm159_vm1, %v223_v22 }
 0x1d2   :  { %v251_v28 = vpop.f32.mrf.mxu2 }
 0x1d3   :  { %v265_v29 = vmul.f32 %v260_v27, %v251_v28 }
 0x1d5   :  { %v267_v30 = vsel %vm73_vm0, %v265_v29, 0.0 }
 0x1d6   :  { %v268_v31 = vrot.slane %v267_v30, 4 }
 0x1d8   :  { %v269_v32 = vadd.f32 %v268_v31, %v267_v30 }
 0x1da   :  { %v254_v34 = vpop.f32.mrf.mxu2  ;;  %v270_v36 = vrot.slane %v269_v32, 2 }
 0x1db   :  { %v266_v35 = vmul.f32 %v262_v33, %v254_v34 }
 0x1dc   :  { %v271_v39 = vadd.f32 %v270_v36, %v269_v32 }
 0x1dd   :  { %v274_v37 = vsel %vm73_vm0, %v266_v35, 0.0 }
 0x1de   :  { %v275_v38 = vrot.slane %v274_v37, 4  ;;  %v272_v42 = vrot.slane %v271_v39, 1 }
 0x1e0   :  { %v276_v40 = vadd.f32 %v275_v38, %v274_v37  ;;  %v273_v45 = vadd.f32 %v272_v42, %v271_v39 }
 0x1e2   :  { %v277_v41 = vrot.slane %v276_v40, 2 }
 0x1e4   :  { %v278_v43 = vadd.f32 %v277_v41, %v276_v40 }
 0x1e6   :  { %v279_v44 = vrot.slane %v278_v43, 1 }
 0x1e8   :  { %v280_v46 = vadd.f32 %v279_v44, %v278_v43 }
 0x1ea   :  { %v284_v47 = vsel %vm283_vm11, %v280_v46, %v273_v45 }
 0x1eb   :  { %v286_v48 = vadd.f32 %v559_v17, %v284_v47 }
 0x1ed   :  { %353 = vmatmul.msk.f32.vlgmr.msra.gmra.mxu3 %vm73_vm0, %v286_v48 }
 0x270   :  { %v315_v50 = vpop.f32.mrf.mxu3 }
 0x271   :  { %v316_v51 = vadd.f32 %v366_v49, %v315_v50 }
 0x273   :  { %v318_v52 = vmax.f32 %v316_v51, 0.0 }
 0x275   :  { %v319_v53 = vadd.f32 %v318_v52, %v286_v48 }
 0x277   :  { %v321_v17 = vrot.slane %v319_v53, 1  ;;  %324 = vst.msk [vmem:[#allocation7] sm:$0x1] %vm323_vm12, %v319_v53 }
 0x279   :  { %325 = vst.msk [vmem:[#allocation7 + $0x1] sm:$0x1] %vm323_vm12, %v321_v17 }
 0x27a   :  { %338 = dma.vmem_to_hbm [thread:$0]  %s331_s5, 32, %s333_s25, [#allocation4], %s460_s26, %s460_s26, %s461_s27  }
 0x27b   :  { %451 = dma.done.wait [#allocation4], 32  }
 0x27c   :  { %452 = vsyncadd [#allocation4], 4294967264 }
 0x27d   :  { %343 = vsyncpa [#allocation3], 1 }
 0x27e   :  { %344 = vsyncpa [#allocation6], 1 }
 0x27f   :  { %345 = vsyncpa [#allocation4], 1 }

</bundles_post_ra>
